<compile_context>
chip_gen: v7x
topology: tpu7x:2x2x1
jax: 0.10.0
libtpu: 0.0.40
codegen_flags: <defaults>
</compile_context>

<pallas_src>
import numpy as np
import jax
import jax.numpy as jnp
from jax.experimental import pallas as pl
from jax.experimental.pallas import tpu as pltpu


def _round_up(x, m):
    return ((x + m - 1) // m) * m


def _pick_tile(dim, cap, align):
    """Even-split tile size: full-extent block if it fits, else ~dim/nblk
    rounded up to `align` (avoids padding dim up to the next multiple of cap)."""
    if dim <= cap:
        return dim                      # block == full array dim is always legal
    nblk = -(-dim // cap)
    return _round_up(-(-dim // nblk), align)


# ---------------------------------------------------------------------------
# Kernel 1: Gaussian (RBF) kernel matrix, optionally + ridge * I on the diagonal
#   K[i,j] = exp(-||a_i - b_j||^2 / (2 sigma^2))   (+ ridge if i == j)
#   The wrapper pre-scales a, b by 1/(sqrt(2)*sigma) and augments them so the
#   whole exponent is a single MXU contraction; the kernel is dot -> min -> exp.
# ---------------------------------------------------------------------------
def _gauss_kernel(a_ref, bt_ref, out_ref):
    expo = jnp.dot(a_ref[...], bt_ref[...], preferred_element_type=jnp.float32)
    out_ref[...] = jnp.exp(jnp.minimum(expo, 0.0))      # clamp: exact sign of -d2


def _gauss_ridge_kernel(tm, tn):
    def kernel(a_ref, bt_ref, ridge_ref, out_ref):
        expo = jnp.dot(a_ref[...], bt_ref[...], preferred_element_type=jnp.float32)
        out_ref[...] = jnp.exp(jnp.minimum(expo, 0.0))

        i = pl.program_id(0)
        j = pl.program_id(1)
        row0 = i * tm
        col0 = j * tn

        # Only diagonal-overlapping blocks pay for the iota / select / add.
        @pl.when(jnp.logical_and(row0 < col0 + tn, col0 < row0 + tm))
        def _():
            rows = row0 + jax.lax.broadcasted_iota(jnp.int32, (tm, tn), 0)
            cols = col0 + jax.lax.broadcasted_iota(jnp.int32, (tm, tn), 1)
            out_ref[...] += jnp.where(rows == cols, ridge_ref[0], 0.0)

    return kernel


def gauss_pallas(a, b, sigma, *, ridge=None, tile_cap=1024):
    """Tiled RBF kernel matrix between rows of a (n1, dz) and b (n2, dz).
    If `ridge` is given, adds ridge * I (square, symmetric case) in-kernel."""
    n1, dz = a.shape
    n2 = b.shape[0]

    # Wrapper-side prep touches only tiny (n, dz)-shaped arrays (not the
    # 'pre-scale the big inputs' anti-pattern).
    scale = 1.0 / (np.sqrt(2.0) * float(sigma))
    a_s = a.astype(jnp.float32) * scale
    b_s = b.astype(jnp.float32) * scale
    asq = jnp.sum(a_s * a_s, axis=1, keepdims=True)             # (n1, 1)
    bsq = jnp.sum(b_s * b_s, axis=1, keepdims=True)             # (n2, 1)
    a_aug = jnp.concatenate(
        [2.0 * a_s, -asq, -jnp.ones((n1, 1), jnp.float32)], axis=1)   # (n1, dz+2)
    b_aug = jnp.concatenate(
        [b_s, jnp.ones((n2, 1), jnp.float32), bsq], axis=1)           # (n2, dz+2)
    k = dz + 2
    kp = _round_up(max(k, 8), 8)                                # MXU-friendly K
    if kp != k:
        a_aug = jnp.pad(a_aug, ((0, 0), (0, kp - k)))
        b_aug = jnp.pad(b_aug, ((0, 0), (0, kp - k)))
    bt = b_aug.T                                                # tiny (kp, n2) copy

    tm = _pick_tile(n1, tile_cap, 8)
    tn = _pick_tile(n2, tile_cap, 128)
    grid = (pl.cdiv(n1, tm), pl.cdiv(n2, tn))
    # NOTE(v7x megacore): at small n this grid may have < 4 blocks per parallel
    # axis; shrink tile_cap for load balance only if n stays modest and the
    # kernel is not overhead-bound.

    in_specs = [pl.BlockSpec((tm, kp), lambda i, j: (i, 0)),
                pl.BlockSpec((kp, tn), lambda i, j: (0, j))]
    args = [a_aug, bt]
    if ridge is not None:
        in_specs.append(pl.BlockSpec(memory_space=pltpu.MemorySpace.SMEM))
        args.append(jnp.asarray(ridge, jnp.float32).reshape(1))
        kernel = _gauss_ridge_kernel(tm, tn)
    else:
        kernel = _gauss_kernel

    return pl.pallas_call(
        kernel,
        out_shape=jax.ShapeDtypeStruct((n1, n2), jnp.float32),
        grid=grid,
        in_specs=in_specs,
        out_specs=pl.BlockSpec((tm, tn), lambda i, j: (i, j)),
        compiler_params=pltpu.CompilerParams(
            dimension_semantics=("parallel", "parallel"),
            vmem_limit_bytes=32 * 1024 * 1024),
    )(*args)


# ---------------------------------------------------------------------------
# Kernel 2: cos/sin weighting, reductions over n and the complex ratio, kept in
# (n, b) orientation (gamma_x consumed untransposed, lane-dense (2, b) output),
# tiled + parallel over b.
#   theta[j,i] = x[j] * chi[i]
#   cg = cos(theta)*gamma ; sg = sin(theta)*gamma
#   d_re = sum_j cg ; d_im = sum_j sg ; n_re = sum_j cg*x ; n_im = sum_j sg*x
#   out[0,:] = Re(numer/denom), out[1,:] = Im(numer/denom)
# ---------------------------------------------------------------------------
def _stage_m_body(chi_ref, x_ref, g_ref, out_ref):
    chi = chi_ref[...]                                  # (1, tb)
    x = x_ref[...]                                      # (n, 1)
    g = g_ref[...]                                      # (n, tb)  = gamma_x tile
    n, tb = g.shape

    xb = jnp.broadcast_to(x, (n, tb))                   # hoisted once (no CSE of
    theta = xb * chi                                    #  broadcast_in_dim in JAX)
    cg = jnp.cos(theta) * g                             # factored once,
    sg = jnp.sin(theta) * g                             # reused below

    d_re = jnp.sum(cg, axis=0, keepdims=True)           # (1, tb)
    d_im = jnp.sum(sg, axis=0, keepdims=True)
    n_re = jnp.sum(cg * xb, axis=0, keepdims=True)
    n_im = jnp.sum(sg * xb, axis=0, keepdims=True)
    # NOTE: at production n*b (>~1e5 elems) replace the four cross-sublane
    # reductions + cg*x / sg*x with two MXU contractions against W = [ones | x].

    inv = 1.0 / (d_re * d_re + d_im * d_im)             # exact: one (1,tb) vreg
    out_ref[0:1, :] = (n_re * d_re + n_im * d_im) * inv  # Re
    out_ref[1:2, :] = (n_im * d_re - n_re * d_im) * inv  # Im


def stage_m_pallas(chi_row, x_col, gamma, *, tile_b_cap=512):
    n, b = gamma.shape
    tb = _pick_tile(b, tile_b_cap, 128)
    grid = (pl.cdiv(b, tb),)
    # TODO(synk): for very large n, also tile n as a trailing "arbitrary"
    # reduction axis with (1, tb) scratch accumulators (v7x VMEM is 64 MiB).
    return pl.pallas_call(
        _stage_m_body,
        out_shape=jax.ShapeDtypeStruct((2, b), jnp.float32),
        grid=grid,
        in_specs=[pl.BlockSpec((1, tb), lambda j: (0, j)),
                  pl.BlockSpec((n, 1), lambda j: (0, 0)),
                  pl.BlockSpec((n, tb), lambda j: (0, j))],
        out_specs=pl.BlockSpec((2, tb), lambda j: (0, j)),
        compiler_params=pltpu.CompilerParams(
            dimension_semantics=("parallel",),
            vmem_limit_bytes=32 * 1024 * 1024),
    )(chi_row, x_col, gamma)


# ---------------------------------------------------------------------------
# Forward pass (mirrors StageMModel.forward, learnable-lambda branch:
# params = [x_init.flatten(), log(0.05)], x = params[:-1], lambda_x = params[-1])
# ---------------------------------------------------------------------------
def stage_m_forward(params, Z1, Z_m, Chi, idx, sigmaZ):
    n = Z1.shape[0]
    x = params[:-1]                     # (n,)
    lambda_x = params[-1]
    zb = Z_m[idx]                       # (b, dz)
    chi_b = Chi[idx]                    # (b, 1)
    b = zb.shape[0]

    # A = K(Z1,Z1) + n*exp(lambda_x)*I, ridge fused into the kernel (no eye(n),
    # no extra HBM pass); K_Z1z produced by a second exact-shape call.
    ridge = n * jnp.exp(lambda_x)
    A = gauss_pallas(Z1, Z1, sigmaZ, ridge=ridge)        # (n, n)
    K_Z1z = gauss_pallas(Z1, zb, sigmaZ)                 # (n, b)

    # TODO(synk): torch.linalg.solve has no clean Pallas equivalent; plain JAX.
    gamma_x = jnp.linalg.solve(A, K_Z1z)                 # (n, b), no transpose

    packed = stage_m_pallas(chi_b.reshape(1, b), x.reshape(n, 1), gamma_x)
    re = packed[0].reshape(b, 1)
    im = packed[1].reshape(b, 1)
    return (re + 1j * im).astype(jnp.complex64)          # (b, 1) complex64


# ---------------------------------------------------------------------------
# Pure-JAX reference for validation
# ---------------------------------------------------------------------------
def _gauss_ref(A, B, sigma):
    d2 = jnp.sum((A[:, None, :] - B[None, :, :]) ** 2, axis=-1)
    return jnp.exp(-d2 / (2.0 * sigma * sigma))


def _forward_ref(params, Z1, Z_m, Chi, idx, sigmaZ):
    n = Z1.shape[0]
    x = params[:-1]
    lambda_x = params[-1]
    zb = Z_m[idx]
    chi_b = Chi[idx]
    K11 = _gauss_ref(Z1, Z1, sigmaZ)
    K1z = _gauss_ref(Z1, zb, sigmaZ)
    gamma = jnp.linalg.solve(K11 + n * jnp.exp(lambda_x) * jnp.eye(n), K1z)
    theta = chi_b @ x.reshape(1, -1)
    cos_t, sin_t = jnp.cos(theta), jnp.sin(theta)
    gT = gamma.T
    xr = x.reshape(1, -1)
    denom = (jnp.sum(cos_t * gT, -1, keepdims=True)
             + 1j * jnp.sum(sin_t * gT, -1, keepdims=True))
    numer = (jnp.sum(cos_t * gT * xr, -1, keepdims=True)
             + 1j * jnp.sum(sin_t * gT * xr, -1, keepdims=True))
    return numer / denom


if __name__ == "__main__":
    key = jax.random.PRNGKey(0)
    n, dz, Nm, b = 128, 2, 64, 8
    sigmaZ = 1.0

    k1, k2, k3, k4, k5 = jax.random.split(key, 5)
    Z1 = jax.random.normal(k1, (n, dz), jnp.float32)       # stage1_MNZ.Z
    M = 0.5 * jax.random.normal(k2, (n,), jnp.float32)     # stage1_MNZ.M
    N = 0.5 * jax.random.normal(k3, (n,), jnp.float32)     # stage1_MNZ.N
    Z_m = jax.random.normal(k4, (Nm, dz), jnp.float32)     # stageM_data.Z
    Chi = jax.random.normal(k5, (Nm, 1), jnp.float32)      # stageM_data.Chi

    # params = cat([x_initialiser.flatten(), log(0.05)])   (learnable-lambda branch)
    x_init = (M + N) / 2.0
    params = jnp.concatenate([x_init, jnp.array([np.log(0.05)], jnp.float32)])

    idx = jnp.arange(b)

    out = stage_m_forward(params, Z1, Z_m, Chi, idx, sigmaZ)
    out = jax.block_until_ready(out)

    ref = _forward_ref(params, Z1, Z_m, Chi, idx, sigmaZ)
    assert out.shape == (b, 1) and out.dtype == jnp.complex64
    # Exact reciprocal in the complex division now; residual diff comes only
    # from the MXU-form squared distance feeding the (well-conditioned) solve.
    np.testing.assert_allclose(np.asarray(out), np.asarray(ref),
                               rtol=2e-3, atol=5e-5)

    print("KERNEL_OK")
</pallas_src>

<mosaic_0001>
module attributes {stable_mosaic.version = 11 : i64} {
  func.func @kernel(%arg0: i32, %arg1: i32, %arg2: memref<128x8xf32, #tpu.memory_space<vmem>>, %arg3: memref<8x128xf32, #tpu.memory_space<vmem>>, %arg4: memref<1xf32, #tpu.memory_space<smem>>, %arg5: memref<128x128xf32, #tpu.memory_space<vmem>>) attributes {dimension_semantics = [#tpu.dimension_semantics<parallel>, #tpu.dimension_semantics<parallel>], iteration_bounds = array<i64: 1, 1>, scalar_prefetch = 0 : i64, scratch_operands = 0 : i64, tpu.core_type = #tpu.core_type<tc>, window_params = [{transform_indices = @transform_0, window_bounds = array<i64: 128, 8>}, {transform_indices = @transform_1, window_bounds = array<i64: 8, 128>}, {transform_indices = @transform_2, window_bounds = array<i64: 1>}, {transform_indices = @transform_3, window_bounds = array<i64: 128, 128>}]} {
    %c0 = arith.constant 0 : index
    %c0_0 = arith.constant 0 : index
    %0 = vector.load %arg2[%c0, %c0_0] : memref<128x8xf32, #tpu.memory_space<vmem>>, vector<128x8xf32>
    %c0_1 = arith.constant 0 : index
    %c0_2 = arith.constant 0 : index
    %1 = vector.load %arg3[%c0_1, %c0_2] : memref<8x128xf32, #tpu.memory_space<vmem>>, vector<8x128xf32>
    %cst = arith.constant dense<0.000000e+00> : vector<128x128xf32>
    %2 = tpu.matmul %0, %1, %cst {dimension_numbers = #tpu.dot_dimension_numbers<[1], [0], [0], [1], [0, 0, 1, 1], [], []>} : vector<128x8xf32>, vector<8x128xf32>, vector<128x128xf32> -> vector<128x128xf32>
    %cst_3 = arith.constant 0.000000e+00 : f32
    %3 = vector.broadcast %cst_3 : f32 to vector<128x128xf32>
    %4 = arith.minimumf %2, %3 : vector<128x128xf32>
    %5 = math.exp %4 : vector<128x128xf32>
    %c0_4 = arith.constant 0 : index
    %c0_5 = arith.constant 0 : index
    %6 = vector.load %arg5[%c0_4, %c0_5] : memref<128x128xf32, #tpu.memory_space<vmem>>, vector<128x128xf32>
    tpu.vector_store %arg5[%c0_4, %c0_5], %5 {strides = array<i32>} : memref<128x128xf32, #tpu.memory_space<vmem>>, vector<128x128xf32>,
    %c128_i32 = arith.constant 128 : i32
    %7 = arith.muli %arg0, %c128_i32 : i32
    %c128_i32_6 = arith.constant 128 : i32
    %8 = arith.muli %arg1, %c128_i32_6 : i32
    %c128_i32_7 = arith.constant 128 : i32
    %9 = arith.addi %8, %c128_i32_7 : i32
    %10 = arith.cmpi slt, %7, %9 : i32
    %c128_i32_8 = arith.constant 128 : i32
    %11 = arith.addi %7, %c128_i32_8 : i32
    %12 = arith.cmpi slt, %8, %11 : i32
    %13 = arith.andi %10, %12 : i1
    %14 = arith.extui %13 : i1 to i32
    %c0_i32 = arith.constant 0 : i32
    %15 = arith.cmpi ne, %14, %c0_i32 : i32
    scf.if %15 {
      %16 = tpu.iota {dimensions = array<i32: 0>} : vector<128x128xi32>
      %17 = vector.broadcast %7 : i32 to vector<128x128xi32>
      %18 = arith.addi %17, %16 : vector<128x128xi32>
      %19 = tpu.iota {dimensions = array<i32: 1>} : vector<128x128xi32>
      %20 = vector.broadcast %8 : i32 to vector<128x128xi32>
      %21 = arith.addi %20, %19 : vector<128x128xi32>
      %c0_9 = arith.constant 0 : index
      %c0_10 = arith.constant 0 : index
      %22 = vector.load %arg5[%c0_9, %c0_10] : memref<128x128xf32, #tpu.memory_space<vmem>>, vector<128x128xf32>
      %23 = arith.cmpi eq, %18, %21 : vector<128x128xi32>
      %c0_11 = arith.constant 0 : index
      %24 = memref.load %arg4[%c0_11] : memref<1xf32, #tpu.memory_space<smem>>
      %cst_12 = arith.constant 0.000000e+00 : f32
      %25 = vector.broadcast %24 : f32 to vector<128x128xf32>
      %26 = vector.broadcast %cst_12 : f32 to vector<128x128xf32>
      %27 = arith.select %23, %25, %26 : vector<128x128xi1>, vector<128x128xf32>
      %28 = arith.addf %22, %27 : vector<128x128xf32>
      %c0_13 = arith.constant 0 : index
      %c0_14 = arith.constant 0 : index
      %29 = vector.load %arg5[%c0_13, %c0_14] : memref<128x128xf32, #tpu.memory_space<vmem>>, vector<128x128xf32>
      tpu.vector_store %arg5[%c0_13, %c0_14], %28 {strides = array<i32>} : memref<128x128xf32, #tpu.memory_space<vmem>>, vector<128x128xf32>,
    } else {
    }
    return
  }
  func.func @transform_0(%arg0: i32, %arg1: i32) -> (i32, i32) {
    %c0_i32 = arith.constant 0 : i32
    %c0_i32_0 = arith.constant 0 : i32
    return %arg0, %c0_i32 : i32, i32
  }
  func.func @transform_1(%arg0: i32, %arg1: i32) -> (i32, i32) {
    %c0_i32 = arith.constant 0 : i32
    %c0_i32_0 = arith.constant 0 : i32
    return %c0_i32, %arg1 : i32, i32
  }
  func.func @transform_2(%arg0: i32, %arg1: i32) -> i32 {
    %c0_i32 = arith.constant 0 : i32
    %c0_i32_0 = arith.constant 0 : i32
    return %c0_i32 : i32
  }
  func.func @transform_3(%arg0: i32, %arg1: i32) -> (i32, i32) {
    %c0_i32 = arith.constant 0 : i32
    return %arg0, %arg1 : i32, i32
  }
}

</mosaic_0001>

<bundles_post_ra>
// kernel: tpu_custom_call.1
= control target key start
LH: loop header
LB: loop body
LE: loop exit
PB: predicated region body
PF: predicated region fallthrough
CT: control target
= control target key end

     0   :  { %vm33_vm0 = vcmask 64512   ;;  %s736_s0 = inlined_call_operand.vmem [shape: f32[128,8], index: 0, kind: input, shape index: {}]   ;;  %s737_s1 = inlined_call_operand.vmem [shape: f32[8,128], index: 1, kind: input, shape index: {}]   ;;  %s738_s2 = inlined_call_operand.<no memory space> [shape: f32[1], index: 2, kind: input, shape index: {}]   ;;  %s739_s3 = inlined_call_operand.hbm [shape: f32[128,128], index: 3, kind: output, shape index: {}]  }
   0x1   :  { %v32_v0 = vld [vmem:[%s737_s1] sm:$0xff]  ;;  %v17_v3 = vld [vmem:[%s736_s0 + $0x8] sm:$0xff]  ;;  %v18_v5 = vld [vmem:[%s736_s0 + $0x10] sm:$0xff] }
   0x2   :  { %v16_v1 = vld [vmem:[%s736_s0] sm:$0xff]  ;;  %470 = vmatprep.subr.mxu0 %v32_v0  ;;  %496 = vmatprep.subr.mxu1 %v32_v0  ;;  %v25_v4 = vld [vmem:[%s736_s0 + $0x48] sm:$0xff]  ;;  %v26_v6 = vld [vmem:[%s736_s0 + $0x50] sm:$0xff] }
   0x3   :  { %v24_v2 = vld [vmem:[%s736_s0 + $0x40] sm:$0xff]  ;;  %471 = vmatpush3.msra.mxu0 %v32_v0  ;;  %497 = vmatpush3.msra.mxu1 %v32_v0  ;;  %v19_v7 = vld [vmem:[%s736_s0 + $0x18] sm:$0xff] }
   0x4   :  { %472 = vmatprep.mubr.msk.f32.mxu0 %vm33_vm0, %v16_v1  ;;  %484 = vmatprep.mubr.msk.f32.mxu1 %vm33_vm0, %v24_v2  ;;  %v27_v8 = vld [vmem:[%s736_s0 + $0x58] sm:$0xff] }
   0x5   :  { %473 = vmatmul.mubr.msk.f32.vlgmr.msra.gmra.mrb[0].mxu0 %vm33_vm0, %v17_v3  ;;  %485 = vmatmul.mubr.msk.f32.vlgmr.msra.gmra.mrb[0].mxu1 %vm33_vm0, %v25_v4 }
   0x6   :  { %475 = vmatprep.mubr.msk.f32.mxu0 %vm33_vm0, %v18_v5  ;;  %487 = vmatprep.mubr.msk.f32.mxu1 %vm33_vm0, %v26_v6 }
   0x7   :  { %9 = vsyncpa [#allocation4], 0  ;;  %v20_v9 = vld [vmem:[%s736_s0 + $0x20] sm:$0xff]  ;;  %v21_v11 = vld [vmem:[%s736_s0 + $0x28] sm:$0xff]  ;;  %v301_v17 = vlaneseq  ;;  %v658_v23 = vstv %s738_s2 }
   0x8   :  { %v28_v10 = vld [vmem:[%s736_s0 + $0x60] sm:$0xff]  ;;  %v29_v12 = vld [vmem:[%s736_s0 + $0x68] sm:$0xff]  ;;  %v22_v13 = vld [vmem:[%s736_s0 + $0x30] sm:$0xff] }
   0x9   :  { %476 = vmatmul.mubr.msk.f32.gmra.mrb[2].mxu0 %vm33_vm0, %v19_v7  ;;  %488 = vmatmul.mubr.msk.f32.gmra.mrb[2].mxu1 %vm33_vm0, %v27_v8  ;;  %v30_v14 = vld [vmem:[%s736_s0 + $0x70] sm:$0xff]  ;;  %v23_v15 = vld [vmem:[%s736_s0 + $0x38] sm:$0xff]  ;;  %v647_v18 = vshrl.u32 %v301_v17, 7  ;;  %v650_v20 = vand.u32 127, %v301_v17 }
   0xa   :  { %478 = vmatprep.mubr.msk.f32.mxu0 %vm33_vm0, %v20_v9  ;;  %490 = vmatprep.mubr.msk.f32.mxu1 %vm33_vm0, %v28_v10  ;;  %v31_v16 = vld [vmem:[%s736_s0 + $0x78] sm:$0xff]  ;;  %s557_s0 = smov [#allocation3]  }
   0xb   :  { %v303_v19 = vadd.s32 8, %v647_v18  ;;  %v311_v21 = vadd.s32 72, %v647_v18  ;;  %v310_v22 = vadd.s32 64, %v647_v18  ;;  %vm355_vm3 = vcmp.eq.s32.totalorder %v647_v18, %v650_v20  ;;  %s426_s2 = sshll.u32 %s557_s0, 4  ;;  %s427_s2 = int_to_ptr.vmem [resolvable:$true] %s426_s2 }
   0xc   :  { %v671_v31 = vsel %vm355_vm3, %v658_v23, 0.0  ;;  %v305_v36 = vadd.s32 24, %v647_v18  ;;  %v313_v39 = vadd.s32 88, %v647_v18  ;;  %v304_v40 = vadd.s32 16, %v647_v18  ;;  %s533_s20 = scalar_lea.vmem %s427_s2, 2048  ;;  %p538_p1 = scmp.lt.s32.totalorder %s427_s2, %s427_s2 }
   0xd   :  { %479 = vmatmul.mubr.msk.f32.gmra.mrb[4].mxu0 %vm33_vm0, %v21_v11  ;;  %491 = vmatmul.mubr.msk.f32.gmra.mrb[4].mxu1 %vm33_vm0, %v29_v12  ;;  %vm356_vm1 = vcmp.eq.s32.totalorder %v303_v19, %v650_v20  ;;  %vm364_vm2 = vcmp.eq.s32.totalorder %v311_v21, %v650_v20  ;;  %vm363_vm4 = vcmp.eq.s32.totalorder %v310_v22, %v650_v20  ;;  %v312_v49 = vadd.s32 80, %v647_v18  ;;  %p534_p0 = scmp.ne.s32.totalorder %s427_s2, %s533_s20  ;;  %p539_p2 = scmp.lt.s32.totalorder %s533_s20, %s533_s20 }
   0xe   :  { %481 = vmatprep.mubr.msk.f32.mxu0 %vm33_vm0, %v22_v13  ;;  %493 = vmatprep.mubr.msk.f32.mxu1 %vm33_vm0, %v30_v14  ;;  %v665_v25 = vsel %vm356_vm1, %v658_v23, 0.0  ;;  %v668_v29 = vsel %vm364_vm2, %v658_v23, 0.0  ;;  %v674_v35 = vsel %vm363_vm4, %v658_v23, 0.0  ;;  %vm358_vm5 = vcmp.eq.s32.totalorder %v305_v36, %v650_v20 }
   0xf   :  { %vm366_vm6 = vcmp.eq.s32.totalorder %v313_v39, %v650_v20  ;;  %vm357_vm7 = vcmp.eq.s32.totalorder %v304_v40, %v650_v20  ;;  %v376_v58 = vsel %vm358_vm5, %v658_v23, 0.0  ;;  %vm365_vm8 = vcmp.eq.s32.totalorder %v312_v49, %v650_v20  ;;  %p540_p3 = por %p539_p2, %p538_p1 }
  0x10   :  { %v384_v63 = vsel %vm366_vm6, %v658_v23, 0.0  ;;  %v375_v2 = vsel %vm357_vm7, %v658_v23, 0.0  ;;  %v307_v9 = vadd.s32 40, %v647_v18  ;;  %v315_v14 = vadd.s32 104, %v647_v18 }
  0x11   :  { %482 = vmatmul.mubr.msk.f32.gmra.mrb[6].mxu0 %vm33_vm0, %v23_v15  ;;  %494 = vmatmul.mubr.msk.f32.gmra.mrb[6].mxu1 %vm33_vm0, %v31_v16  ;;  %v306_v19 = vadd.s32 32, %v647_v18  ;;  %v317_v39 = vadd.s32 120, %v647_v18  ;;  %p541_p4 = pnand %p540_p3, %p534_p0 }
  0x12   :  { %vm360_vm9 = vcmp.eq.s32.totalorder %v307_v9, %v650_v20  ;;  %vm368_vm10 = vcmp.eq.s32.totalorder %v315_v14, %v650_v20 }
  0x13   :  { %vm359_vm11 = vcmp.eq.s32.totalorder %v306_v19, %v650_v20  ;;  %vm370_vm14 = vcmp.eq.s32.totalorder %v317_v39, %v650_v20 }
  0xd8   :  { %v474_v24 = vpop.f32.mrb[0].mxu0  ;;  %v486_v26 = vpop.f32.mrb[0].mxu1 }
  0xd9   :  { %v228_v27 = vmin.f32 %v474_v24, 0.0  ;;  %v236_v28 = vmin.f32 %v486_v26, 0.0  ;;  %v148_v30 = vpop.f32.mrb[1].mxu0  ;;  %v188_v32 = vpop.f32.mrb[1].mxu1 }
  0xda   :  { %v227_v33 = vmin.f32 %v148_v30, 0.0  ;;  %v235_v34 = vmin.f32 %v188_v32, 0.0 }
  0xdb   :  { %v245_v37 = vmul.f32 1.442695, %v228_v27  ;;  %v261_v38 = vmul.f32 1.442695, %v236_v28 }
  0xdc   :  { %v243_v41 = vmul.f32 1.442695, %v227_v33  ;;  %v259_v42 = vmul.f32 1.442695, %v235_v34  ;;  %v477_v43 = vpop.f32.mrb[2].mxu0  ;;  %v489_v44 = vpop.f32.mrb[2].mxu1 }
  0xdd   :  { %501 = vpow2.f32 %v245_v37  ;;  %v230_v45 = vmin.f32 %v477_v43, 0.0  ;;  %v238_v46 = vmin.f32 %v489_v44, 0.0  ;;  %v158_v47 = vpop.f32.mrb[3].mxu0  ;;  %v198_v48 = vpop.f32.mrb[3].mxu1  ;;  %v383_v33 = vsel %vm365_vm8, %v658_v23, 0.0 }
  0xde   :  { %503 = vpow2.f32 %v261_v38  ;;  %v229_v50 = vmin.f32 %v158_v47, 0.0  ;;  %v237_v51 = vmin.f32 %v198_v48, 0.0  ;;  %v314_v34 = vadd.s32 96, %v647_v18 }
  0xdf   :  { %505 = vpow2.f32 %v243_v41  ;;  %v249_v52 = vmul.f32 1.442695, %v230_v45  ;;  %v265_v53 = vmul.f32 1.442695, %v238_v46  ;;  %v316_v44 = vadd.s32 112, %v647_v18 }
  0xe0   :  { %507 = vpow2.f32 %v259_v42  ;;  %v247_v54 = vmul.f32 1.442695, %v229_v50  ;;  %v263_v55 = vmul.f32 1.442695, %v237_v51  ;;  %v480_v56 = vpop.f32.mrb[4].mxu0  ;;  %v492_v57 = vpop.f32.mrb[4].mxu1  ;;  %vm367_vm12 = vcmp.eq.s32.totalorder %v314_v34, %v650_v20 }
  0xe1   :  { %509 = vpow2.f32 %v249_v52  ;;  %v232_v59 = vmin.f32 %v480_v56, 0.0  ;;  %v240_v60 = vmin.f32 %v492_v57, 0.0  ;;  %v168_v61 = vpop.f32.mrb[5].mxu0  ;;  %v208_v62 = vpop.f32.mrb[5].mxu1  ;;  %v386_v47 = vsel %vm368_vm10, %v658_v23, 0.0 }
  0xe2   :  { %511 = vpow2.f32 %v265_v53  ;;  %v231_v0 = vmin.f32 %v168_v61, 0.0  ;;  %v239_v1 = vmin.f32 %v208_v62, 0.0  ;;  %v377_v50 = vsel %vm359_vm11, %v658_v23, 0.0 }
  0xe3   :  { %513 = vpow2.f32 %v247_v54  ;;  %v253_v3 = vmul.f32 1.442695, %v232_v59  ;;  %v269_v4 = vmul.f32 1.442695, %v240_v60  ;;  %v385_v52 = vsel %vm367_vm12, %v658_v23, 0.0 }
  0xe4   :  { %515 = vpow2.f32 %v263_v55  ;;  %v251_v5 = vmul.f32 1.442695, %v231_v0  ;;  %v267_v6 = vmul.f32 1.442695, %v239_v1  ;;  %v483_v7 = vpop.f32.mrb[6].mxu0  ;;  %v495_v8 = vpop.f32.mrb[6].mxu1  ;;  %vm369_vm0 = vcmp.eq.s32.totalorder %v316_v44, %v650_v20 }
  0xe5   :  { %517 = vpow2.f32 %v253_v3  ;;  %v234_v10 = vmin.f32 %v483_v7, 0.0  ;;  %v242_v11 = vmin.f32 %v495_v8, 0.0  ;;  %v178_v12 = vpop.f32.mrb[7].mxu0  ;;  %v218_v13 = vpop.f32.mrb[7].mxu1  ;;  %v387_v0 = vsel %vm369_vm0, %v658_v23, 0.0 }
  0xe6   :  { %519 = vpow2.f32 %v269_v4  ;;  %v233_v15 = vmin.f32 %v178_v12, 0.0  ;;  %v241_v16 = vmin.f32 %v218_v13, 0.0 }
  0xe7   :  { %v502_v17 = vpop.eup %501  ;;  %521 = vpow2.f32 %v251_v5  ;;  %v257_v21 = vmul.f32 1.442695, %v234_v10  ;;  %v273_v22 = vmul.f32 1.442695, %v242_v11 }
  0xe8   :  { %v504_v24 = vpop.eup %503  ;;  %v390_v26 = vadd.f32 %v502_v17, %v665_v25  ;;  %523 = vpow2.f32 %v267_v6  ;;  %v255_v27 = vmul.f32 1.442695, %v233_v15  ;;  %v271_v28 = vmul.f32 1.442695, %v241_v16 }
  0xe9   :  { %v506_v30 = vpop.eup %505  ;;  %v398_v32 = vadd.f32 %v504_v24, %v668_v29  ;;  %525 = vpow2.f32 %v257_v21  ;;  %v309_v25 = vadd.s32 56, %v647_v18 }
  0xea   :  { %v508_v36 = vpop.eup %507  ;;  %406 = vst [vmem:[#allocation3 + $0x8] sm:$0xff] %v390_v26  ;;  %v389_v37 = vadd.f32 %v506_v30, %v671_v31  ;;  %527 = vpow2.f32 %v273_v22  ;;  %v308_v31 = vadd.s32 48, %v647_v18 }
  0xeb   :  { %v510_v38 = vpop.eup %509  ;;  %414 = vst [vmem:[#allocation3 + $0x48] sm:$0xff] %v398_v32  ;;  %v397_v29 = vadd.f32 %v508_v36, %v674_v35  ;;  %529 = vpow2.f32 %v255_v27  ;;  %v378_v35 = vsel %vm360_vm9, %v658_v23, 0.0  ;;  %vm362_vm13 = vcmp.eq.s32.totalorder %v309_v25, %v650_v20 }
  0xec   :  { %v512_v40 = vpop.eup %511  ;;  %405 = vst [vmem:[#allocation3] sm:$0xff] %v389_v37  ;;  %v392_v41 = vadd.f32 %v510_v38, %v376_v58  ;;  %531 = vpow2.f32 %v271_v28  ;;  %vm361_vm15 = vcmp.eq.s32.totalorder %v308_v31, %v650_v20  ;;  %v380_v55 = vsel %vm362_vm13, %v658_v23, 0.0 }
  0xed   :  { %v514_v42 = vpop.eup %513  ;;  %413 = vst [vmem:[#allocation3 + $0x40] sm:$0xff] %v397_v29  ;;  %v400_v43 = vadd.f32 %v512_v40, %v384_v63  ;;  %v388_v58 = vsel %vm370_vm14, %v658_v23, 0.0  ;;  %v379_v61 = vsel %vm361_vm15, %v658_v23, 0.0 }
  0xee   :  { %v516_v45 = vpop.eup %515  ;;  %408 = vst [vmem:[#allocation3 + $0x18] sm:$0xff] %v392_v41  ;;  %v391_v46 = vadd.f32 %v514_v42, %v375_v2 }
  0xef   :  { %v518_v48 = vpop.eup %517  ;;  %416 = vst [vmem:[#allocation3 + $0x58] sm:$0xff] %v400_v43  ;;  %v399_v49 = vadd.f32 %v516_v45, %v383_v33 }
  0xf0   :  { %v520_v51 = vpop.eup %519  ;;  %407 = vst [vmem:[#allocation3 + $0x10] sm:$0xff] %v391_v46  ;;  %v394_v18 = vadd.f32 %v518_v48, %v378_v35 }
  0xf1   :  { %v522_v53 = vpop.eup %521  ;;  %415 = vst [vmem:[#allocation3 + $0x50] sm:$0xff] %v399_v49  ;;  %v402_v54 = vadd.f32 %v520_v51, %v386_v47 }
  0xf2   :  { %v524_v56 = vpop.eup %523  ;;  %410 = vst [vmem:[#allocation3 + $0x28] sm:$0xff] %v394_v18  ;;  %v393_v57 = vadd.f32 %v522_v53, %v377_v50 }
  0xf3   :  { %v526_v59 = vpop.eup %525  ;;  %418 = vst [vmem:[#allocation3 + $0x68] sm:$0xff] %v402_v54  ;;  %v401_v60 = vadd.f32 %v524_v56, %v385_v52 }
  0xf4   :  { %v528_v62 = vpop.eup %527  ;;  %409 = vst [vmem:[#allocation3 + $0x20] sm:$0xff] %v393_v57  ;;  %v396_v63 = vadd.f32 %v526_v59, %v380_v55 }
  0xf5   :  { %v530_v1 = vpop.eup %529  ;;  %417 = vst [vmem:[#allocation3 + $0x60] sm:$0xff] %v401_v60  ;;  %v404_v20 = vadd.f32 %v528_v62, %v388_v58 }
  0xf6   :  { %v532_v2 = vpop.eup %531  ;;  %412 = vst [vmem:[#allocation3 + $0x38] sm:$0xff] %v396_v63  ;;  %v395_v3 = vadd.f32 %v530_v1, %v379_v61 }
  0xf7   :  { %420 = vst [vmem:[#allocation3 + $0x78] sm:$0xff] %v404_v20  ;;  %v403_v4 = vadd.f32 %v532_v2, %v387_v0 }
  0xf8   :  { %411 = vst [vmem:[#allocation3 + $0x30] sm:$0xff] %v395_v3 }
  0xf9   :  { %419 = vst [vmem:[#allocation3 + $0x70] sm:$0xff] %v403_v4 }
  0xfa   :  { %544 = shalt.err (!%p541_p4)
}
  0xfb   :  { %s545_s22 = scalar_lea.hbm %s739_s3, 2048 }
  0xfc   :  { %p546_p5 = scmp.ne.s32.totalorder %s739_s3, %s545_s22  ;;  %p549_p6 = scmp.lt.u32.totalorder %s545_s22, %s739_s3 }
  0xfe   :  { %p551_p7 = pnand %p549_p6, %p546_p5 }
 0x100   :  { %554 = shalt.err (!%p551_p7)
}
 0x101   :  { %s558_s27 = smov 128   ;;  %s559_s28 = smov 8  }
 0x102   :  { %432 = dma.vmem_to_hbm [thread:$0]  %s427_s2, 2048, %s739_s3, [#allocation4], %s558_s27, %s558_s27, %s559_s28  }
 0x103   :  { %555 = dma.done.wait [#allocation4], 2048  }
 0x104   :  { %556 = vsyncadd [#allocation4], 4294965248 }
 0x105   :  { %436 = vsyncpa [#allocation4], 1 }

</bundles_post_ra>
